<compile_context>
chip_gen: v7x
topology: tpu7x:2x2x1
jax: 0.10.0
libtpu: 0.0.40
codegen_flags: <defaults>
</compile_context>

<pallas_src>
import numpy as np
import jax
import jax.numpy as jnp
from jax import lax
from jax.experimental import pallas as pl
from jax.experimental.pallas import tpu as pltpu

N_STEPS  = 432          # 432 steps of 10 minutes (3 days); 432 = 54 * 8 sublanes
STEP_SEC = 600.0
N_OMNI_T = 8            # synthetic omni2 sequence length
N_OMNI_C = 32           # synthetic omni2 feature channels
HIDDEN   = 128          # MXU-native width on v5e; half of the 256-wide v6e/v7x array


def density_surrogate_kernel(scal_ref, omni_ref, w1_base_ref, w1_omni_ref,
                             b1_ref, w2_ref, dens_ref):
    # scal_ref (SMEM f32[4]) = [lat_feat (=0*lat0), lon_feat (=0*lon0), alt_feat, unused]
    lat_f = scal_ref[0]
    lon_f = scal_ref[1]
    alt_f = scal_ref[2]

    # Row-constant part of the layer-1 pre-activation: the omni2 aggregate and the
    # (constant) lat/lon/alt features only contribute a single (1, H) row, so the
    # (1,32)x(32,128) matvec is folded into the bias instead of assembling a
    # (432,128) feature matrix with lane-axis concatenates.
    omni_mean = jnp.mean(omni_ref[...], axis=0, keepdims=True)                      # (1, C)
    c = (jnp.dot(omni_mean, w1_omni_ref[...], preferred_element_type=jnp.float32)
         + lat_f * w1_base_ref[1:2, :]      # keeps 0*lat NaN-propagation semantics
         + lon_f * w1_base_ref[2:3, :]
         + alt_f * w1_base_ref[3:4, :]
         + b1_ref[...])                                                             # (1, H)

    # Only the (normalized) time feature varies with the step -> layer 1 is a
    # single broadcast FMA on the VPU instead of a (432,128)x(128,128) matmul.
    t_idx  = lax.broadcasted_iota(jnp.int32, (N_STEPS, 1), 0)                       # int iota: robust lowering
    t_norm = t_idx.astype(jnp.float32) * jnp.float32(1.0 / N_STEPS)                 # (N, 1)
    h = jnp.maximum(t_norm * w1_base_ref[0:1, :] + c, 0.0)                          # (N, H)

    # Layer 2: bf16 operands on the MXU, f32 accumulation, lane-dense writeback.
    out = jnp.dot(h.astype(jnp.bfloat16), w2_ref[...],
                  preferred_element_type=jnp.float32)                               # (N, H)
    dens_ref[...] = jnp.abs(out) * 1e-12                                            # positive density-like


def participant_forward(omni2_data, initial_state, params):
    """Returns a dict of 432-length arrays: Timestamp, Latitude, Longitude, Altitude, Density."""
    w1_base, w1_omni, b1, w2 = params

    start_time = float(initial_state['Timestamp'])
    lat0 = float(initial_state['Latitude (deg)'])
    lon0 = float(initial_state['Longitude (deg)'])
    alt0 = float(initial_state['Altitude (km)'])

    # ---- trajectory: pure constant/iota arithmetic, done outside the kernel ----
    # host float64 timestamps (f32 epoch seconds would quantize to ~128 s)
    timestamps = np.float64(start_time) + np.arange(N_STEPS, dtype=np.float64) * STEP_SEC
    lat_arr = jnp.zeros((N_STEPS,), jnp.float32) * jnp.float32(lat0)   # 0 * lat (NaN-propagating, like np)
    lon_arr = jnp.zeros((N_STEPS,), jnp.float32) * jnp.float32(lon0)   # 0 * lon
    # if np.max(alt_array) > 1000: alt_array /= 1000   (constant array -> scalar branch)
    alt_val = alt0 / 1000.0 if alt0 > 1000.0 else alt0
    alt_arr = jnp.full((N_STEPS,), alt_val, jnp.float32)

    # scalar features handed to the density surrogate: exactly the values the
    # original model sees in input_data (no second altitude normalization)
    scal = jnp.array([0.0 * lat0, 0.0 * lon0, alt_val, 0.0], dtype=jnp.float32)

    cost = pl.CostEstimate(flops=14_400_000, transcendentals=0, bytes_accessed=280_000)

    dens = pl.pallas_call(
        density_surrogate_kernel,
        out_shape=jax.ShapeDtypeStruct((N_STEPS, HIDDEN), jnp.float32),
        in_specs=[pl.BlockSpec(memory_space=pltpu.MemorySpace.SMEM),   # scalar features f32[4]
                  pl.BlockSpec(memory_space=pltpu.MemorySpace.VMEM),   # omni2 (8, 32)
                  pl.BlockSpec(memory_space=pltpu.MemorySpace.VMEM),   # w1_base (8, 128)
                  pl.BlockSpec(memory_space=pltpu.MemorySpace.VMEM),   # w1_omni (32, 128)
                  pl.BlockSpec(memory_space=pltpu.MemorySpace.VMEM),   # b1 (1, 128)
                  pl.BlockSpec(memory_space=pltpu.MemorySpace.VMEM)],  # w2 (128, 128) bf16
        out_specs=pl.BlockSpec(memory_space=pltpu.MemorySpace.VMEM),
        cost_estimate=cost,
    )(scal, omni2_data, w1_base, w1_omni, b1, w2)

    # only column 0 is consumed; lax.slice (not advanced indexing) keeps it a cheap view-style slice
    density = jnp.squeeze(lax.slice(dens, (0, 0), (N_STEPS, 1)), axis=1)

    return {
        'Timestamp': timestamps,      # float64 host array: exact 600 s spacing
        'Latitude':  lat_arr,
        'Longitude': lon_arr,
        'Altitude':  alt_arr,
        'Density':   density,
    }


def make_params(key):
    k1, k2, k3 = jax.random.split(key, 3)
    # w1_base rows: 0 = time, 1 = lat, 2 = lon, 3 = alt, 4..7 = unused (sublane pad)
    w1_base = jax.random.normal(k1, (8, HIDDEN), jnp.float32) * 0.02
    w1_omni = jax.random.normal(k2, (N_OMNI_C, HIDDEN), jnp.float32) * 0.02
    b1 = jnp.zeros((1, HIDDEN), jnp.float32)
    w2 = (jax.random.normal(k3, (HIDDEN, HIDDEN), jnp.float32) * 0.02).astype(jnp.bfloat16)
    return w1_base, w1_omni, b1, w2


if __name__ == "__main__":
    key = jax.random.PRNGKey(0)
    k_omni, k_par = jax.random.split(key)

    # synthetic omni2 driver data: (seq=8, channels=32)
    omni2_data = jax.random.normal(k_omni, (N_OMNI_T, N_OMNI_C), jnp.float32)

    initial_state = {
        'Timestamp': 1.7e9,            # epoch seconds (stand-in for datetime)
        'Latitude (deg)': 12.3,
        'Longitude (deg)': -45.6,
        'Altitude (km)': 480.0,        # < 1000 -> no rescale branch
    }

    params = make_params(k_par)

    result = participant_forward(omni2_data, initial_state, params)
    jax.block_until_ready(result)

    # basic sanity checks of the forward semantics
    assert result['Latitude'].shape == (N_STEPS,)
    assert result['Density'].shape == (N_STEPS,)
    assert float(jnp.abs(result['Latitude']).max()) == 0.0
    assert float(jnp.abs(result['Longitude']).max()) == 0.0
    assert float(jnp.abs(result['Altitude'][0] - 480.0)) < 1e-3
    assert float(result['Density'].min()) >= 0.0
    assert bool(jnp.all(jnp.isfinite(result['Density'])))
    # float64 timestamps keep exact 10-minute spacing (no f32 epoch quantization)
    assert result['Timestamp'].dtype == np.float64
    assert result['Timestamp'][1] - result['Timestamp'][0] == STEP_SEC

    print("KERNEL_OK")
</pallas_src>

<mosaic_0001>
module attributes {stable_mosaic.version = 11 : i64} {
  func.func @density_surrogate_kernel(%arg0: memref<4xf32, #tpu.memory_space<smem>>, %arg1: memref<8x32xf32, #tpu.memory_space<vmem>>, %arg2: memref<8x128xf32, #tpu.memory_space<vmem>>, %arg3: memref<32x128xf32, #tpu.memory_space<vmem>>, %arg4: memref<1x128xf32, #tpu.memory_space<vmem>>, %arg5: memref<128x128xbf16, #tpu.memory_space<vmem>>, %arg6: memref<432x128xf32, #tpu.memory_space<vmem>>) attributes {dimension_semantics = [], scalar_prefetch = 0 : i64, scratch_operands = 0 : i64, tpu.core_type = #tpu.core_type<tc>} {
    %c0 = arith.constant 0 : index
    %0 = memref.load %arg0[%c0] : memref<4xf32, #tpu.memory_space<smem>>
    %c1 = arith.constant 1 : index
    %1 = memref.load %arg0[%c1] : memref<4xf32, #tpu.memory_space<smem>>
    %c2 = arith.constant 2 : index
    %2 = memref.load %arg0[%c2] : memref<4xf32, #tpu.memory_space<smem>>
    %c0_0 = arith.constant 0 : index
    %c0_1 = arith.constant 0 : index
    %3 = vector.load %arg1[%c0_0, %c0_1] : memref<8x32xf32, #tpu.memory_space<vmem>>, vector<8x32xf32>
    %cst = arith.constant dense<0.000000e+00> : vector<32xf32>
    %4 = vector.multi_reduction <add>, %3, %cst [0] : vector<8x32xf32> to vector<32xf32>
    %5 = vector.shape_cast %4 : vector<32xf32> to vector<1x32xf32>
    %cst_2 = arith.constant 8.000000e+00 : f32
    %6 = vector.broadcast %cst_2 : f32 to vector<1x32xf32>
    %7 = arith.divf %5, %6 : vector<1x32xf32>
    %c0_3 = arith.constant 0 : index
    %c0_4 = arith.constant 0 : index
    %8 = vector.load %arg3[%c0_3, %c0_4] : memref<32x128xf32, #tpu.memory_space<vmem>>, vector<32x128xf32>
    %cst_5 = arith.constant dense<0.000000e+00> : vector<1x128xf32>
    %9 = tpu.matmul %7, %8, %cst_5 {dimension_numbers = #tpu.dot_dimension_numbers<[1], [0], [0], [1], [0, 0, 1, 1], [], []>} : vector<1x32xf32>, vector<32x128xf32>, vector<1x128xf32> -> vector<1x128xf32>
    %c1_6 = arith.constant 1 : index
    %c0_7 = arith.constant 0 : index
    %10 = vector.load %arg2[%c1_6, %c0_7] : memref<8x128xf32, #tpu.memory_space<vmem>>, vector<1x128xf32>
    %11 = vector.broadcast %0 : f32 to vector<1x128xf32>
    %12 = arith.mulf %11, %10 : vector<1x128xf32>
    %13 = arith.addf %9, %12 : vector<1x128xf32>
    %c2_8 = arith.constant 2 : index
    %c0_9 = arith.constant 0 : index
    %14 = vector.load %arg2[%c2_8, %c0_9] : memref<8x128xf32, #tpu.memory_space<vmem>>, vector<1x128xf32>
    %15 = vector.broadcast %1 : f32 to vector<1x128xf32>
    %16 = arith.mulf %15, %14 : vector<1x128xf32>
    %17 = arith.addf %13, %16 : vector<1x128xf32>
    %c3 = arith.constant 3 : index
    %c0_10 = arith.constant 0 : index
    %18 = vector.load %arg2[%c3, %c0_10] : memref<8x128xf32, #tpu.memory_space<vmem>>, vector<1x128xf32>
    %19 = vector.broadcast %2 : f32 to vector<1x128xf32>
    %20 = arith.mulf %19, %18 : vector<1x128xf32>
    %21 = arith.addf %17, %20 : vector<1x128xf32>
    %c0_11 = arith.constant 0 : index
    %c0_12 = arith.constant 0 : index
    %22 = vector.load %arg4[%c0_11, %c0_12] : memref<1x128xf32, #tpu.memory_space<vmem>>, vector<1x128xf32>
    %23 = arith.addf %21, %22 : vector<1x128xf32>
    %24 = tpu.iota {dimensions = array<i32: 0>} : vector<432x1xi32>
    %25 = arith.sitofp %24 : vector<432x1xi32> to vector<432x1xf32>
    %cst_13 = arith.constant 0.00231481483 : f32
    %26 = vector.broadcast %cst_13 : f32 to vector<432x1xf32>
    %27 = arith.mulf %25, %26 : vector<432x1xf32>
    %c0_14 = arith.constant 0 : index
    %c0_15 = arith.constant 0 : index
    %28 = vector.load %arg2[%c0_14, %c0_15] : memref<8x128xf32, #tpu.memory_space<vmem>>, vector<1x128xf32>
    %29 = vector.broadcast %27 : vector<432x1xf32> to vector<432x128xf32>
    %30 = vector.broadcast %28 : vector<1x128xf32> to vector<432x128xf32>
    %31 = arith.mulf %29, %30 : vector<432x128xf32>
    %32 = vector.broadcast %23 : vector<1x128xf32> to vector<432x128xf32>
    %33 = arith.addf %31, %32 : vector<432x128xf32>
    %cst_16 = arith.constant 0.000000e+00 : f32
    %34 = vector.broadcast %cst_16 : f32 to vector<432x128xf32>
    %35 = arith.maximumf %33, %34 : vector<432x128xf32>
    %36 = arith.truncf %35 : vector<432x128xf32> to vector<432x128xbf16>
    %c0_17 = arith.constant 0 : index
    %c0_18 = arith.constant 0 : index
    %37 = vector.load %arg5[%c0_17, %c0_18] : memref<128x128xbf16, #tpu.memory_space<vmem>>, vector<128x128xbf16>
    %cst_19 = arith.constant dense<0.000000e+00> : vector<432x128xf32>
    %38 = tpu.matmul %36, %37, %cst_19 {dimension_numbers = #tpu.dot_dimension_numbers<[1], [0], [0], [1], [0, 0, 1, 1], [], []>} : vector<432x128xbf16>, vector<128x128xbf16>, vector<432x128xf32> -> vector<432x128xf32>
    %39 = math.absf %38 : vector<432x128xf32>
    %cst_20 = arith.constant 9.99999996E-13 : f32
    %40 = vector.broadcast %cst_20 : f32 to vector<432x128xf32>
    %41 = arith.mulf %39, %40 : vector<432x128xf32>
    %c0_21 = arith.constant 0 : index
    %c0_22 = arith.constant 0 : index
    %42 = vector.load %arg6[%c0_21, %c0_22] : memref<432x128xf32, #tpu.memory_space<vmem>>, vector<432x128xf32>
    tpu.vector_store %arg6[%c0_21, %c0_22], %41 {strides = array<i32>} : memref<432x128xf32, #tpu.memory_space<vmem>>, vector<432x128xf32>,
    return
  }
}

</mosaic_0001>

<bundles_post_ra>
// kernel: tpu_custom_call.1
= control target key start
LH: loop header
LB: loop body
LE: loop exit
PB: predicated region body
PF: predicated region fallthrough
CT: control target
= control target key end

     0   :  { %11 = vsyncpa [#allocation5], 0  ;;  %s1925_s0 = inlined_call_operand.hbm [shape: f32[4], index: 0, kind: input, shape index: {}]   ;;  %s1926_s1 = inlined_call_operand.hbm [shape: f32[8,32], index: 1, kind: input, shape index: {}]   ;;  %s1927_s2 = inlined_call_operand.hbm [shape: f32[8,128], index: 2, kind: input, shape index: {}]   ;;  %s1928_s3 = inlined_call_operand.hbm [shape: f32[32,128], index: 3, kind: input, shape index: {}]   ;;  %s1929_s4 = inlined_call_operand.vmem [shape: f32[1,128], index: 4, kind: input, shape index: {}]   ;;  %s1930_s5 = inlined_call_operand.hbm [shape: bf16[128,128], index: 5, kind: input, shape index: {}]   ;;  %s1931_s6 = inlined_call_operand.hbm [shape: f32[432,128], index: 6, kind: output, shape index: {}]  }
   0x1   :  { %12 = vsyncpa [#allocation3], 0 }
   0x2   :  { %13 = vsyncpa [#allocation8], 0 }
   0x3   :  { %14 = vsyncpa [#allocation11], 0 }
   0x4   :  { %15 = vsyncpa [#allocation4], 0  ;;  %s1407_s21 = smov [#allocation7]   ;;  %s1408_s23 = smov [#allocation6]  }
   0x5   :  { %s40_s22 = sshll.u32 %s1407_s21, 4  ;;  %s30_s24 = sshll.u32 %s1408_s23, 4  ;;  %s41_s22 = int_to_ptr.vmem [resolvable:$true] %s40_s22  ;;  %s31_s24 = int_to_ptr.vmem [resolvable:$true] %s30_s24 }
   0x6   :  { %s1277_s27 = scalar_lea.hbm %s1927_s2, 128 }
   0x7   :  { %p1278_p0 = scmp.ne.s32.totalorder %s1927_s2, %s1277_s27  ;;  %p1281_p1 = scmp.lt.u32.totalorder %s1277_s27, %s1927_s2 }
   0x9   :  { %p1283_p2 = pnand %p1281_p1, %p1278_p0 }
   0xb   :  { %1286 = shalt.err (!%p1283_p2)
}
   0xc   :  { %s1287_s8 = scalar_lea.vmem %s41_s22, 128  ;;  %p1292_p4 = scmp.lt.s32.totalorder %s41_s22, %s41_s22 }
   0xd   :  { %p1288_p3 = scmp.ne.s32.totalorder %s41_s22, %s1287_s8  ;;  %p1293_p5 = scmp.lt.s32.totalorder %s1287_s8, %s1287_s8 }
   0xf   :  { %p1294_p6 = por %p1293_p5, %p1292_p4 }
  0x11   :  { %p1295_p7 = pnand %p1294_p6, %p1288_p3 }
  0x13   :  { %1298 = shalt.err (!%p1295_p7)
}
  0x14   :  { %43 = dma.hbm_to_vmem [thread:$0]  %s1927_s2, 128, %s41_s22, [#allocation8]  }
  0x15   :  { %s1299_s13 = scalar_lea.hbm %s1925_s0, 16 }
  0x16   :  { %p1300_p8 = scmp.ne.s32.totalorder %s1925_s0, %s1299_s13  ;;  %p1303_p9 = scmp.lt.u32.totalorder %s1299_s13, %s1925_s0 }
  0x18   :  { %p1305_p10 = pnand %p1303_p9, %p1300_p8 }
  0x1a   :  { %1308 = shalt.err (!%p1305_p10)
}
  0x1b   :  { %s1409_s18 = smov [#allocation2]   ;;  %s1309_s22 = scalar_lea.hbm %s1926_s1, 128 }
  0x1c   :  { %23 = dma.hbm_to_smem %s1925_s0, 16, %s1409_s18, [#allocation5]  }
  0x1d   :  { %p1310_p11 = scmp.ne.s32.totalorder %s1926_s1, %s1309_s22  ;;  %p1313_p12 = scmp.lt.u32.totalorder %s1309_s22, %s1926_s1 }
  0x1f   :  { %p1315_p13 = pnand %p1313_p12, %p1310_p11 }
  0x21   :  { %1318 = shalt.err (!%p1315_p13)
}
  0x22   :  { %s1319_s28 = scalar_lea.vmem %s31_s24, 128  ;;  %p1324_p1 = scmp.lt.s32.totalorder %s31_s24, %s31_s24 }
  0x23   :  { %p1320_p0 = scmp.ne.s32.totalorder %s31_s24, %s1319_s28  ;;  %p1325_p2 = scmp.lt.s32.totalorder %s1319_s28, %s1319_s28 }
  0x25   :  { %p1326_p3 = por %p1325_p2, %p1324_p1 }
  0x27   :  { %p1327_p4 = pnand %p1326_p3, %p1320_p0 }
  0x29   :  { %1330 = shalt.err (!%p1327_p4)
}
  0x2a   :  { %33 = dma.hbm_to_vmem [thread:$0]  %s1926_s1, 128, %s31_s24, [#allocation3]  }
  0x2b   :  { %s1410_s30 = smov [#allocation9]   ;;  %s1331_s10 = scalar_lea.hbm %s1928_s3, 512 }
  0x2c   :  { %s49_s7 = sshll.u32 %s1410_s30, 4  ;;  %p1332_p5 = scmp.ne.s32.totalorder %s1928_s3, %s1331_s10  ;;  %s50_s7 = int_to_ptr.vmem [resolvable:$true] %s49_s7 }
  0x2d   :  { %p1335_p6 = scmp.lt.u32.totalorder %s1331_s10, %s1928_s3 }
  0x2f   :  { %p1337_p7 = pnand %p1335_p6, %p1332_p5 }
  0x31   :  { %1340 = shalt.err (!%p1337_p7)
}
  0x32   :  { %s1341_s15 = scalar_lea.vmem %s50_s7, 512  ;;  %p1346_p9 = scmp.lt.s32.totalorder %s50_s7, %s50_s7 }
  0x33   :  { %p1342_p8 = scmp.ne.s32.totalorder %s50_s7, %s1341_s15  ;;  %p1347_p10 = scmp.lt.s32.totalorder %s1341_s15, %s1341_s15 }
  0x35   :  { %p1348_p11 = por %p1347_p10, %p1346_p9 }
  0x37   :  { %p1349_p12 = pnand %p1348_p11, %p1342_p8 }
  0x39   :  { %1352 = shalt.err (!%p1349_p12)
}
  0x3a   :  { %s1411_s1 = smov 128   ;;  %s1412_s24 = smov 8  }
  0x3b   :  { %55 = dma.hbm_to_vmem [thread:$0]  %s1928_s3, 512, %s50_s7, [#allocation8], %s1411_s1, %s1411_s1, %s1412_s24  }
  0x3c   :  { %s1413_s18 = smov [#allocation10]   ;;  %s1353_s21 = scalar_lea.hbm %s1930_s5, 1024 }
  0x3d   :  { %s63_s19 = sshll.u32 %s1413_s18, 4  ;;  %p1354_p13 = scmp.ne.s32.totalorder %s1930_s5, %s1353_s21  ;;  %s64_s19 = int_to_ptr.vmem [resolvable:$true] %s63_s19 }
  0x3e   :  { %p1357_p0 = scmp.lt.u32.totalorder %s1353_s21, %s1930_s5 }
  0x40   :  { %p1359_p1 = pnand %p1357_p0, %p1354_p13 }
  0x42   :  { %1362 = shalt.err (!%p1359_p1)
}
  0x43   :  { %s1363_s27 = scalar_lea.vmem %s64_s19, 1024  ;;  %p1368_p3 = scmp.lt.s32.totalorder %s64_s19, %s64_s19 }
  0x44   :  { %p1364_p2 = scmp.ne.s32.totalorder %s64_s19, %s1363_s27  ;;  %p1369_p4 = scmp.lt.s32.totalorder %s1363_s27, %s1363_s27 }
  0x46   :  { %p1370_p5 = por %p1369_p4, %p1368_p3 }
  0x48   :  { %p1371_p6 = pnand %p1370_p5, %p1364_p2 }
  0x4a   :  { %1374 = shalt.err (!%p1371_p6)
}
  0x4b   :  { %s1414_s3 = smov 64   ;;  %s1415_s28 = smov 4  }
  0x4c   :  { %69 = dma.hbm_to_vmem [thread:$0]  %s1930_s5, 1024, %s64_s19, [#allocation11], %s1414_s3, %s1414_s3, %s1415_s28  }
  0x4d   :  { %1397 = dma.done.wait [#allocation5], 16  }
  0x4e   :  { %1398 = vsyncadd [#allocation5], 4294967280 }
  0x4f   :  { %1399 = dma.done.wait [#allocation3], 128  }
  0x50   :  { %1400 = vsyncadd [#allocation3], 4294967168 }
  0x51   :  { %1401 = dma.done.wait [#allocation8], 640  }
  0x52   :  { %1402 = vsyncadd [#allocation8], 4294966656 }
  0x53   :  { %1403 = dma.done.wait [#allocation11], 1024  }
  0x54   :  { %1404 = vsyncadd [#allocation11], 4294966272 }
  0x55   :  { %85 = sfence }
  0x56   :  { %v101_v0 = vld [vmem:[#allocation9] sm:$0xff]  ;;  %v102_v1 = vld [vmem:[#allocation9 + $0x8] sm:$0xff]  ;;  %v103_v2 = vld [vmem:[#allocation9 + $0x10] sm:$0xff]  ;;  %v1416_v3 = vmov 0.0|0.0   ;;  %vm1417_vm0 = vmmov 0   ;;  %v1932_v6 = vmov 0.0   ;;  %v191_v25 = vlaneseq }
  0x57   :  { %1234 = vmatprep.subr.bf16.mxu0 %v1416_v3  ;;  %v1235_v4 = vpack.c.bf16 %v102_v1, %v101_v0  ;;  %v104_v5 = vld [vmem:[#allocation9 + $0x18] sm:$0xff]  ;;  %1107 = vmatprep.mubr.msk.f32.mxu0 %vm1417_vm0, %v1932_v6  ;;  %v90_v7 = vld [vmem:[#allocation6] sm:$0xff]  ;;  %vm91_vm1 = vcmask 261120   ;;  %v1269_v9 = vld [vmem:[#allocation10] sm:$0xff]   ;;  %s87_s5 = sld [smem:[#allocation2]]  ;;  %s1047_s30 = sld [smem:[#allocation2 + $0x1]] }
  0x58   :  { %v92_v8 = vsel %vm91_vm1, %v90_v7, 0.0  ;;  %1240 = vmatprep.subr.bf16.mxu1 %v1932_v6  ;;  %1178 = vmatprep.mubr.msk.bf16.mxu1 %vm1417_vm0, %v1932_v6  ;;  %v1238_v10 = vpack.c.bf16 %v104_v5, %v103_v2  ;;  %v1270_v12 = vld [vmem:[#allocation10 + $0x8] sm:$0xff]   ;;  %v1271_v15 = vld [vmem:[#allocation10 + $0x10] sm:$0xff]   ;;  %v1272_v18 = vld [vmem:[#allocation10 + $0x18] sm:$0xff]   ;;  %v1542_v26 = vshrl.u32 %v191_v25, 7  ;;  %s1048_s7 = sld [smem:[#allocation2 + $0x2]] }
  0x59   :  { %1236 = vmatpush3.bf16.msra.mxu0 %v1235_v4  ;;  %v93_v11 = vrot.slane %v92_v8, 4  ;;  %1248 = vmatpush3.bf16.msra.mxu1 %v1269_v9  ;;  %v1273_v21 = vld [vmem:[#allocation10 + $0x20] sm:$0xff]   ;;  %v1274_v22 = vld [vmem:[#allocation10 + $0x28] sm:$0xff]   ;;  %v1275_v23 = vld [vmem:[#allocation10 + $0x30] sm:$0xff]  }
  0x5a   :  { %1237 = vmatprep.subr.bf16.mxu0 %v1416_v3  ;;  %1241 = vmatprep.subr.bf16.mxu1 %v1932_v6  ;;  %v1276_v24 = vld [vmem:[#allocation10 + $0x38] sm:$0xff]   ;;  %v208_v27 = vadd.s32 128, %v1542_v26  ;;  %v209_v28 = vadd.s32 136, %v1542_v26  ;;  %v234_v32 = vadd.s32 336, %v1542_v26  ;;  %v235_v35 = vadd.s32 344, %v1542_v26 }
  0x5b   :  { %v94_v13 = vadd.f32 %v93_v11, %v92_v8  ;;  %v1546_v31 = vld [vmem:[#allocation7] ss:$0 sm:$0xff]  ;;  %v210_v36 = vadd.s32 144, %v1542_v26  ;;  %v211_v38 = vadd.s32 152, %v1542_v26  ;;  %v236_v39 = vadd.s32 352, %v1542_v26 }
  0x5c   :  { %v262_v29 = vcvt.s32.f32 %v208_v27  ;;  %v263_v30 = vcvt.s32.f32 %v209_v28  ;;  %v288_v37 = vcvt.s32.f32 %v234_v32  ;;  %v237_v40 = vadd.s32 360, %v1542_v26 }
  0x5d   :  { %1239 = vmatpush3.bf16.msra.mxu0 %v1238_v10  ;;  %v95_v14 = vrot.slane %v94_v13, 2  ;;  %1249 = vmatpush3.bf16.msra.mxu1 %v1270_v12  ;;  %v289_v43 = vcvt.s32.f32 %v235_v35  ;;  %v264_v44 = vcvt.s32.f32 %v210_v36  ;;  %v265_v46 = vcvt.s32.f32 %v211_v38 }
  0x5e   :  { %1110 = vmatprep.subr.bf16.mxu0 %v1932_v6  ;;  %1242 = vmatprep.subr.bf16.mxu1 %v1932_v6  ;;  %v316_v33 = vmul.f32 0.0023148148, %v262_v29  ;;  %v317_v34 = vmul.f32 0.0023148148, %v263_v30  ;;  %v342_v45 = vmul.f32 0.0023148148, %v288_v37  ;;  %v290_v47 = vcvt.s32.f32 %v236_v39 }
  0x5f   :  { %v96_v16 = vadd.f32 %v95_v14, %v94_v13  ;;  %v291_v48 = vcvt.s32.f32 %v237_v40  ;;  %v343_v49 = vmul.f32 0.0023148148, %v289_v43  ;;  %v318_v50 = vmul.f32 0.0023148148, %v264_v44 }
  0x60   :  { %v1555_v41 = vmul.f32 %v1546_v31, %v316_v33  ;;  %v1558_v42 = vmul.f32 %v1546_v31, %v317_v34  ;;  %v212_v51 = vadd.s32 160, %v1542_v26  ;;  %v213_v52 = vadd.s32 168, %v1542_v26 }
  0x61   :  { %v97_v17 = vrot.slane %v96_v16, 1  ;;  %1250 = vmatpush3.bf16.msra.mxu1 %v1271_v15  ;;  %v1563_v53 = vmul.f32 %v1546_v31, %v342_v45  ;;  %v319_v54 = vmul.f32 0.0023148148, %v265_v46  ;;  %v344_v55 = vmul.f32 0.0023148148, %v290_v47 }
  0x62   :  { %1243 = vmatprep.subr.bf16.mxu1 %v1932_v6  ;;  %v345_v56 = vmul.f32 0.0023148148, %v291_v48  ;;  %v1566_v57 = vmul.f32 %v1546_v31, %v343_v49  ;;  %v1569_v58 = vmul.f32 %v1546_v31, %v318_v50  ;;  %v266_v59 = vcvt.s32.f32 %v212_v51 }
  0x63   :  { %v98_v19 = vadd.f32 %v97_v17, %v96_v16  ;;  %v267_v60 = vcvt.s32.f32 %v213_v52  ;;  %v1572_v61 = vmul.f32 %v1546_v31, %v319_v54  ;;  %v1575_v62 = vmul.f32 %v1546_v31, %v344_v55 }
  0x64   :  { %v1578_v63 = vmul.f32 %v1546_v31, %v345_v56  ;;  %v238_v0 = vadd.s32 368, %v1542_v26  ;;  %v320_v1 = vmul.f32 0.0023148148, %v266_v59  ;;  %v239_v3 = vadd.s32 376, %v1542_v26 }
  0x65   :  { %v100_v20 = vmul.f32 0.125, %v98_v19  ;;  %1251 = vmatpush3.bf16.msra.mxu1 %v1272_v18  ;;  %v321_v2 = vmul.f32 0.0023148148, %v267_v60  ;;  %v214_v4 = vadd.s32 176, %v1542_v26  ;;  %v215_v7 = vadd.s32 184, %v1542_v26 }
  0x66   :  { %1244 = vmatprep.subr.bf16.mxu1 %v1932_v6  ;;  %v292_v5 = vcvt.s32.f32 %v238_v0  ;;  %v240_v8 = vadd.s32 384, %v1542_v26  ;;  %v1587_v10 = vmul.f32 %v1546_v31, %v320_v1  ;;  %v242_v35 = vadd.s32 400, %v1542_v26 }
  0x67   :  { %1108 = vmatmul.mubr.msk.f32.vlgmr.msra.gmra.mrb[0].mxu0 %vm91_vm1, %v100_v20  ;;  %v1590_v11 = vmul.f32 %v1546_v31, %v321_v2  ;;  %v268_v13 = vcvt.s32.f32 %v214_v4  ;;  %v216_v20 = vadd.s32 192, %v1542_v26  ;;  %v243_v38 = vadd.s32 408, %v1542_v26  ;;  %v105_v4 = vld [vmem:[#allocation7 + $0x1] sm:$0x1] }
  0x68   :  { %1111 = vmatpush3.bf16.msra.mxu0 %v1269_v9  ;;  %1126 = vmatprep.mubr.msk.bf16.mxu0 %vm1417_vm0, %v1932_v6  ;;  %v241_v9 = vadd.s32 392, %v1542_v26  ;;  %v346_v14 = vmul.f32 0.0023148148, %v292_v5  ;;  %v294_v16 = vcvt.s32.f32 %v240_v8  ;;  %v244_v39 = vadd.s32 416, %v1542_v26  ;;  %v181_v5 = vld [vmem:[#allocation7 + $0x2] sm:$0x1] }
  0x69   :  { %1112 = vmatprep.subr.bf16.mxu0 %v1932_v6  ;;  %1252 = vmatpush3.bf16.msra.mxu1 %v1273_v21  ;;  %v322_v19 = vmul.f32 0.0023148148, %v268_v13  ;;  %v270_v29 = vcvt.s32.f32 %v216_v20  ;;  %v296_v40 = vcvt.s32.f32 %v242_v35  ;;  %v245_v43 = vadd.s32 424, %v1542_v26 }
  0x6a   :  { %1245 = vmatprep.subr.bf16.mxu1 %v1932_v6  ;;  %v295_v17 = vcvt.s32.f32 %v241_v9  ;;  %v297_v46 = vcvt.s32.f32 %v243_v38  ;;  %v298_v47 = vcvt.s32.f32 %v244_v39  ;;  %v193_v60 = vadd.s32 8, %v1542_v26 }
  0x6b   :  { %v1601_v28 = vmul.f32 %v1546_v31, %v322_v19  ;;  %v324_v36 = vmul.f32 0.0023148148, %v270_v29  ;;  %v350_v48 = vmul.f32 0.0023148148, %v296_v40  ;;  %v299_v49 = vcvt.s32.f32 %v245_v43 }
  0x6c   :  { %1113 = vmatpush3.bf16.msra.mxu0 %v1270_v12  ;;  %v293_v12 = vcvt.s32.f32 %v239_v3  ;;  %v349_v25 = vmul.f32 0.0023148148, %v295_v17  ;;  %v351_v50 = vmul.f32 0.0023148148, %v297_v46  ;;  %v352_v51 = vmul.f32 0.0023148148, %v298_v47 }
  0x6d   :  { %1114 = vmatprep.subr.bf16.mxu0 %v1932_v6  ;;  %1253 = vmatpush3.bf16.msra.mxu1 %v1274_v22  ;;  %v1617_v44 = vmul.f32 %v1546_v31, %v324_v36  ;;  %v1623_v52 = vmul.f32 %v1546_v31, %v350_v48  ;;  %v353_v54 = vmul.f32 0.0023148148, %v299_v49  ;;  %v218_v0 = vadd.s32 208, %v1542_v26 }
  0x6e   :  { %1246 = vmatprep.subr.bf16.mxu1 %v1932_v6  ;;  %v1610_v34 = vmul.f32 %v1546_v31, %v349_v25  ;;  %v1626_v55 = vmul.f32 %v1546_v31, %v351_v50  ;;  %v1629_v56 = vmul.f32 %v1546_v31, %v352_v51  ;;  %v219_v1 = vadd.s32 216, %v1542_v26 }
  0x6f   :  { %v1632_v59 = vmul.f32 %v1546_v31, %v353_v54  ;;  %v106_v2 = vstv %s87_s5  ;;  %v246_v3 = vcvt.s32.f32 %v1542_v26  ;;  %v247_v8 = vcvt.s32.f32 %v193_v60 }
  0x70   :  { %1115 = vmatpush3.bf16.msra.mxu0 %v1271_v15  ;;  %v269_v15 = vcvt.s32.f32 %v215_v7  ;;  %v182_v7 = vstv %s1047_s30  ;;  %v272_v9 = vcvt.s32.f32 %v218_v0  ;;  %v195_v13 = vadd.s32 24, %v1542_v26 }
  0x71   :  { %1116 = vmatprep.subr.bf16.mxu0 %v1932_v6  ;;  %1254 = vmatpush3.bf16.msra.mxu1 %v1275_v23  ;;  %v220_v17 = vadd.s32 224, %v1542_v26  ;;  %v107_v19 = vmul.f32 %v106_v2, %v105_v4  ;;  %v183_v20 = vmul.f32 %v182_v7, %v181_v5  ;;  %v196_v29 = vadd.s32 32, %v1542_v26 }
  0x72   :  { %1247 = vmatprep.subr.bf16.mxu1 %v1932_v6  ;;  %v249_v35 = vcvt.s32.f32 %v195_v13  ;;  %v197_v36 = vadd.s32 40, %v1542_v26  ;;  %v415_v38 = vsub.s32 0, %v1542_v26  ;;  %v223_v47 = vadd.s32 248, %v1542_v26 }
  0x73   :  { %v274_v40 = vcvt.s32.f32 %v220_v17  ;;  %v198_v48 = vadd.s32 48, %v1542_v26  ;;  %v199_v49 = vadd.s32 56, %v1542_v26  ;;  %v250_v60 = vcvt.s32.f32 %v196_v29 }
  0x74   :  { %1117 = vmatpush3.bf16.msra.mxu0 %v1272_v18  ;;  %v347_v18 = vmul.f32 0.0023148148, %v293_v12  ;;  %v194_v12 = vadd.s32 16, %v1542_v26  ;;  %v303_v0 = vmul.f32 0.0023148148, %v249_v35 }
  0x75   :  { %1118 = vmatprep.subr.bf16.mxu0 %v1932_v6  ;;  %1255 = vmatpush3.bf16.msra.mxu1 %v1276_v24  ;;  %v328_v7 = vmul.f32 0.0023148148, %v274_v40  ;;  %v226_v40 = vadd.s32 272, %v1542_v26 }
  0x76   :  { %v1598_v27 = vmul.f32 %v1546_v31, %v347_v18  ;;  %v221_v18 = vadd.s32 232, %v1542_v26  ;;  %v248_v25 = vcvt.s32.f32 %v194_v12 }
  0x78   :  { %1119 = vmatpush3.bf16.msra.mxu0 %v1273_v21  ;;  %v217_v21 = vadd.s32 200, %v1542_v26  ;;  %v275_v43 = vcvt.s32.f32 %v221_v18  ;;  %v302_v54 = vmul.f32 0.0023148148, %v248_v25  ;;  %v304_v18 = vmul.f32 0.0023148148, %v250_v60 }
  0x79   :  { %1120 = vmatprep.subr.bf16.mxu0 %v1932_v6 }
  0x7a   :  { %v271_v30 = vcvt.s32.f32 %v217_v21  ;;  %v300_v21 = vmul.f32 0.0023148148, %v246_v3  ;;  %v224_v3 = vadd.s32 256, %v1542_v26  ;;  %v361_v17 = vmul.f32 %v1546_v31, %v302_v54 }
  0x7b   :  { %v363_v54 = vmul.f32 %v1546_v31, %v304_v18 }
  0x7c   :  { %1121 = vmatpush3.bf16.msra.mxu0 %v1274_v22  ;;  %v1595_v22 = vmul.f32 %v1546_v31, %v346_v14  ;;  %v325_v37 = vmul.f32 0.0023148148, %v271_v30  ;;  %v185_v14 = vld [vmem:[#allocation7 + $0x3] sm:$0x1]  ;;  %v359_v46 = vmul.f32 %v1546_v31, %v300_v21  ;;  %v200_v21 = vadd.s32 64, %v1542_v26 }
  0x7d   :  { %1122 = vmatprep.subr.bf16.mxu0 %v1932_v6  ;;  %v278_v35 = vcvt.s32.f32 %v224_v3 }
  0x7e   :  { %v1620_v45 = vmul.f32 %v1546_v31, %v325_v37  ;;  %v222_v37 = vadd.s32 240, %v1542_v26  ;;  %v254_v60 = vcvt.s32.f32 %v200_v21  ;;  %v203_v21 = vadd.s32 88, %v1542_v26 }
  0x80   :  { %1123 = vmatpush3.bf16.msra.mxu0 %v1275_v23  ;;  %v323_v23 = vmul.f32 0.0023148148, %v269_v15  ;;  %v186_v15 = vstv %s1048_s7  ;;  %v276_v2 = vcvt.s32.f32 %v222_v37  ;;  %v387_v37 = vmul.f32 %v1546_v31, %v328_v7 }
  0x81   :  { %1124 = vmatprep.subr.bf16.mxu0 %v1932_v6  ;;  %v187_v30 = vmul.f32 %v186_v15, %v185_v14  ;;  %v277_v14 = vcvt.s32.f32 %v223_v47  ;;  %v252_v15 = vcvt.s32.f32 %v198_v48 }
  0x82   :  { %v1604_v32 = vmul.f32 %v1546_v31, %v323_v23  ;;  %v301_v23 = vmul.f32 0.0023148148, %v247_v8  ;;  %v329_v8 = vmul.f32 0.0023148148, %v275_v43  ;;  %v330_v29 = vmul.f32 0.0023148148, %v276_v2 }
  0x83   :  { %v331_v47 = vmul.f32 0.0023148148, %v277_v14  ;;  %v306_v48 = vmul.f32 0.0023148148, %v252_v15 }
  0x84   :  { %1125 = vmatpush3.bf16.msra.mxu0 %v1276_v24  ;;  %v348_v24 = vmul.f32 0.0023148148, %v294_v16  ;;  %v273_v16 = vcvt.s32.f32 %v219_v1  ;;  %v360_v50 = vmul.f32 %v1546_v31, %v301_v23  ;;  %v251_v1 = vcvt.s32.f32 %v197_v36  ;;  %v189_v36 = vld [vmem:[%s1929_s4] sm:$0x1]  ;;  %s1419_s4 = smov [#allocation12]  }
  0x85   :  { %v201_v23 = vadd.s32 72, %v1542_v26  ;;  %v365_v14 = vmul.f32 %v1546_v31, %v306_v48  ;;  %s1032_s10 = sshll.u32 %s1419_s4, 4  ;;  %s1033_s10 = int_to_ptr.vmem [resolvable:$true] %s1032_s10 }
  0x86   :  { %v1607_v33 = vmul.f32 %v1546_v31, %v348_v24  ;;  %v326_v24 = vmul.f32 0.0023148148, %v272_v9  ;;  %v327_v39 = vmul.f32 0.0023148148, %v273_v16  ;;  %v225_v9 = vadd.s32 264, %v1542_v26  ;;  %s1375_s11 = scalar_lea.vmem %s1033_s10, 6912  ;;  %p1380_p8 = scmp.lt.s32.totalorder %s1033_s10, %s1033_s10 }
  0x87   :  { %v253_v16 = vcvt.s32.f32 %v199_v49  ;;  %v305_v25 = vmul.f32 0.0023148148, %v251_v1  ;;  %v255_v1 = vcvt.s32.f32 %v201_v23  ;;  %v228_v23 = vadd.s32 288, %v1542_v26  ;;  %p1376_p7 = scmp.ne.s32.totalorder %s1033_s10, %s1375_s11  ;;  %p1381_p9 = scmp.lt.s32.totalorder %s1375_s11, %s1375_s11 }
  0x88   :  { %v385_v51 = vmul.f32 %v1546_v31, %v326_v24  ;;  %v386_v5 = vmul.f32 %v1546_v31, %v327_v39  ;;  %v279_v39 = vcvt.s32.f32 %v225_v9  ;;  %v227_v9 = vadd.s32 280, %v1542_v26 }
  0x89   :  { %v307_v49 = vmul.f32 0.0023148148, %v253_v16  ;;  %v364_v3 = vmul.f32 %v1546_v31, %v305_v25  ;;  %v308_v16 = vmul.f32 0.0023148148, %v254_v60  ;;  %v309_v18 = vmul.f32 0.0023148148, %v255_v1  ;;  %p1382_p10 = por %p1381_p9, %p1380_p8 }
  0x8a   :  { %v333_v7 = vmul.f32 0.0023148148, %v279_v39 }
  0x8b   :  { %v366_v15 = vmul.f32 %v1546_v31, %v307_v49  ;;  %p1383_p11 = pnand %p1382_p10, %p1376_p7 }
 0x13a   :  { %v177_v4 = vpop.f32.mrb[0].mxu0 }
 0x13b   :  { %v178_v12 = vadd.f32 %v177_v4, %v107_v19  ;;  %v1109_v13 = vpop.f32.mrb[1].mxu0  ;;  %v362_v19 = vmul.f32 %v1546_v31, %v303_v0  ;;  %v389_v0 = vmul.f32 %v1546_v31, %v330_v29  ;;  %v332_v4 = vmul.f32 0.0023148148, %v278_v35 }
 0x13c   :  { %v281_v35 = vcvt.s32.f32 %v227_v9 }
 0x13d   :  { %v184_v24 = vadd.f32 %v183_v20, %v178_v12  ;;  %v388_v20 = vmul.f32 %v1546_v31, %v329_v8  ;;  %v280_v12 = vcvt.s32.f32 %v226_v40  ;;  %v390_v8 = vmul.f32 %v1546_v31, %v331_v47 }
 0x13e   :  { %v229_v40 = vadd.s32 296, %v1542_v26  ;;  %v391_v9 = vmul.f32 %v1546_v31, %v332_v4 }
 0x13f   :  { %v188_v43 = vadd.f32 %v187_v30, %v184_v24  ;;  %v202_v30 = vadd.s32 80, %v1542_v26 }
 0x141   :  { %v190_v2 = vadd.f32 %v189_v36, %v188_v43  ;;  %v334_v36 = vmul.f32 0.0023148148, %v280_v12  ;;  %v256_v39 = vcvt.s32.f32 %v202_v30  ;;  %v392_v12 = vmul.f32 %v1546_v31, %v333_v7 }
 0x142   :  { %v335_v30 = vmul.f32 0.0023148148, %v281_v35  ;;  %v205_v7 = vadd.s32 104, %v1542_v26 }
 0x143   :  { %v1670_v13 = vrot.slane %v190_v2, %v415_v38  ;;  %v282_v2 = vcvt.s32.f32 %v228_v23  ;;  %v204_v23 = vadd.s32 96, %v1542_v26 }
 0x145   :  { %v417_v24 = vadd.f32 %v1670_v13, %v359_v46  ;;  %v418_v25 = vadd.f32 %v1670_v13, %v360_v50  ;;  %v443_v29 = vadd.f32 %v1670_v13, %v385_v51  ;;  %v444_v38 = vadd.f32 %v1670_v13, %v386_v5 }
 0x146   :  { %v419_v60 = vadd.f32 %v1670_v13, %v361_v17  ;;  %v420_v1 = vadd.f32 %v1670_v13, %v362_v19  ;;  %v257_v46 = vcvt.s32.f32 %v203_v21  ;;  %v445_v51 = vadd.f32 %v1670_v13, %v387_v37 }
 0x147   :  { %v471_v43 = vmax.f32 %v417_v24, 0.0  ;;  %v472_v47 = vmax.f32 %v418_v25, 0.0  ;;  %v497_v48 = vmax.f32 %v443_v29, 0.0  ;;  %v498_v49 = vmax.f32 %v444_v38, 0.0 }
 0x148   :  { %v446_v5 = vadd.f32 %v1670_v13, %v388_v20  ;;  %v283_v24 = vcvt.s32.f32 %v229_v40  ;;  %v367_v17 = vmul.f32 %v1546_v31, %v308_v16  ;;  %v368_v19 = vmul.f32 %v1546_v31, %v309_v18 }
 0x149   :  { %v525_v50 = vpack.c.bf16 %v472_v47, %v471_v43  ;;  %v538_v6 = vpack.c.bf16 %v498_v49, %v497_v48  ;;  %v310_v21 = vmul.f32 0.0023148148, %v256_v39  ;;  %v1934_v25 = vmov 0.0  }
 0x14a   :  { %v393_v37 = vmul.f32 %v1546_v31, %v334_v36  ;;  %v311_v20 = vmul.f32 0.0023148148, %v257_v46  ;;  %v336_v4 = vmul.f32 0.0023148148, %v282_v2  ;;  %v474_v29 = vmax.f32 %v420_v1, 0.0 }
 0x14b   :  { %1127 = vmatmul.mubr.bf16.vlgmr.msra.gmra.mrb[4].mxu0 %v525_v50  ;;  %1179 = vmatmul.mubr.bf16.vlgmr.msra.gmra.mrb[0].mxu1 %v538_v6  ;;  %v473_v6 = vmax.f32 %v419_v60, 0.0  ;;  %v499_v16 = vmax.f32 %v445_v51, 0.0  ;;  %v500_v38 = vmax.f32 %v446_v5, 0.0  ;;  %v421_v18 = vadd.f32 %v1670_v13, %v363_v54 }
 0x14c   :  { %1130 = vmatprep.mubr.msk.bf16.mxu0 %vm1417_vm0, %v1934_v25  ;;  %1182 = vmatprep.mubr.msk.bf16.mxu1 %vm1417_vm0, %v1934_v25  ;;  %v422_v35 = vadd.f32 %v1670_v13, %v364_v3  ;;  %v394_v39 = vmul.f32 %v1546_v31, %v335_v30  ;;  %v337_v40 = vmul.f32 0.0023148148, %v283_v24  ;;  %v447_v43 = vadd.f32 %v1670_v13, %v389_v0 }
 0x14d   :  { %v448_v47 = vadd.f32 %v1670_v13, %v390_v8  ;;  %v423_v36 = vadd.f32 %v1670_v13, %v365_v14  ;;  %v424_v48 = vadd.f32 %v1670_v13, %v366_v15  ;;  %v1705_v49 = vmul.f32 %v1546_v31, %v310_v21 }
 0x14e   :  { %v1708_v60 = vmul.f32 %v1546_v31, %v311_v20  ;;  %v258_v54 = vcvt.s32.f32 %v204_v23  ;;  %v259_v1 = vcvt.s32.f32 %v205_v7  ;;  %v526_v3 = vpack.c.bf16 %v474_v29, %v473_v6 }
 0x14f   :  { %v539_v46 = vpack.c.bf16 %v500_v38, %v499_v16  ;;  %v449_v2 = vadd.f32 %v1670_v13, %v391_v9  ;;  %v450_v0 = vadd.f32 %v1670_v13, %v392_v12  ;;  %v475_v50 = vmax.f32 %v421_v18, 0.0 }
 0x150   :  { %v476_v8 = vmax.f32 %v422_v35, 0.0  ;;  %v1713_v14 = vadd.s32 304, %v1542_v26  ;;  %v1716_v15 = vadd.s32 312, %v1542_v26  ;;  %v501_v51 = vmax.f32 %v447_v43, 0.0 }
 0x151   :  { %v502_v5 = vmax.f32 %v448_v47, 0.0  ;;  %v477_v30 = vmax.f32 %v423_v36, 0.0  ;;  %v478_v24 = vmax.f32 %v424_v48, 0.0  ;;  %v1723_v9 = vadd.f32 %v1670_v13, %v367_v17 }
 0x152   :  { %v1726_v12 = vmul.f32 %v1546_v31, %v336_v4  ;;  %v1729_v21 = vmul.f32 %v1546_v31, %v337_v40  ;;  %v503_v23 = vmax.f32 %v449_v2, 0.0  ;;  %v504_v20 = vmax.f32 %v450_v0, 0.0 }
 0x153   :  { %1131 = vmatmul.mubr.bf16.gmra.mrb[8].mxu0 %v526_v3  ;;  %1183 = vmatmul.mubr.bf16.gmra.mrb[4].mxu1 %v539_v46  ;;  %v1731_v7 = vmul.f32 0.0023148148, %v258_v54  ;;  %v1733_v6 = vmul.f32 0.0023148148, %v259_v1  ;;  %v1736_v29 = vadd.f32 %v1670_v13, %v368_v19  ;;  %v284_v16 = vcvt.s32.f32 %v1713_v14 }
 0x154   :  { %1134 = vmatprep.mubr.msk.bf16.mxu0 %vm1417_vm0, %v1934_v25  ;;  %1186 = vmatprep.mubr.msk.bf16.mxu1 %vm1417_vm0, %v1934_v25  ;;  %v285_v17 = vcvt.s32.f32 %v1716_v15  ;;  %v1741_v38 = vadd.s32 112, %v1542_v26  ;;  %v527_v4 = vpack.c.bf16 %v476_v8, %v475_v50  ;;  %v540_v18 = vpack.c.bf16 %v502_v5, %v501_v51 }
 0x155   :  { %v528_v35 = vpack.c.bf16 %v478_v24, %v477_v30  ;;  %v433_v40 = vadd.f32 %v1670_v13, %v1555_v41  ;;  %v479_v43 = vmax.f32 %v1723_v9, 0.0  ;;  %v1747_v47 = vadd.f32 %v1670_v13, %v393_v37 }
 0x156   :  { %v1750_v19 = vadd.f32 %v1670_v13, %v394_v39  ;;  %v434_v36 = vadd.f32 %v1670_v13, %v1558_v42  ;;  %v541_v48 = vpack.c.bf16 %v504_v20, %v503_v23  ;;  %v459_v1 = vadd.f32 %v1670_v13, %v1563_v53 }
 0x157   :  { %v487_v54 = vmax.f32 %v433_v40, 0.0  ;;  %v460_v3 = vadd.f32 %v1670_v13, %v1566_v57  ;;  %v480_v41 = vmax.f32 %v1736_v29, 0.0  ;;  %v435_v37 = vadd.f32 %v1670_v13, %v1569_v58 }
 0x158   :  { %v488_v46 = vmax.f32 %v434_v36, 0.0  ;;  %v436_v39 = vadd.f32 %v1670_v13, %v1572_v61  ;;  %v513_v42 = vmax.f32 %v459_v1, 0.0  ;;  %v461_v0 = vadd.f32 %v1670_v13, %v1575_v62 }
 0x159   :  { %v514_v2 = vmax.f32 %v460_v3, 0.0  ;;  %v462_v53 = vadd.f32 %v1670_v13, %v1578_v63  ;;  %v489_v58 = vmax.f32 %v435_v37, 0.0  ;;  %v437_v50 = vadd.f32 %v1670_v13, %v1587_v10 }
 0x15a   :  { %v1771_v57 = vpack.c.bf16 %v488_v46, %v487_v54  ;;  %v490_v61 = vmax.f32 %v436_v39, 0.0  ;;  %v515_v51 = vmax.f32 %v461_v0, 0.0  ;;  %v438_v63 = vadd.f32 %v1670_v13, %v1590_v11 }
 0x15b   :  { %1135 = vmatmul.mubr.bf16.gmra.mrb[12].mxu0 %v527_v4  ;;  %1187 = vmatmul.mubr.bf16.gmra.mrb[8].mxu1 %v540_v18  ;;  %v1775_v8 = vpack.c.bf16 %v514_v2, %v513_v42  ;;  %v516_v62 = vmax.f32 %v462_v53, 0.0  ;;  %v491_v30 = vmax.f32 %v437_v50, 0.0  ;;  %v463_v24 = vadd.f32 %v1670_v13, %v1595_v22 }
 0x15c   :  { %1138 = vmatprep.mubr.msk.bf16.mxu0 %vm1417_vm0, %v1934_v25  ;;  %1190 = vmatprep.mubr.msk.bf16.mxu1 %vm1417_vm0, %v1934_v25  ;;  %v1779_v5 = vpack.c.bf16 %v490_v61, %v489_v58  ;;  %v464_v23 = vadd.f32 %v1670_v13, %v1598_v27  ;;  %v492_v4 = vmax.f32 %v438_v63, 0.0  ;;  %v439_v10 = vadd.f32 %v1670_v13, %v1601_v28 }
 0x15d   :  { %v1785_v20 = vpack.c.bf16 %v516_v62, %v515_v51  ;;  %v440_v18 = vadd.f32 %v1670_v13, %v1604_v32  ;;  %v517_v40 = vmax.f32 %v463_v24, 0.0  ;;  %v465_v36 = vadd.f32 %v1670_v13, %v1607_v33 }
 0x15e   :  { %v518_v11 = vmax.f32 %v464_v23, 0.0  ;;  %v466_v22 = vadd.f32 %v1670_v13, %v1610_v34  ;;  %v1795_v54 = vpack.c.bf16 %v492_v4, %v491_v30  ;;  %v493_v27 = vmax.f32 %v439_v10, 0.0 }
 0x15f   :  { %v494_v1 = vmax.f32 %v440_v18, 0.0  ;;  %v441_v3 = vadd.f32 %v1670_v13, %v1617_v44  ;;  %v519_v28 = vmax.f32 %v465_v36, 0.0  ;;  %v442_v32 = vadd.f32 %v1670_v13, %v1620_v45 }
 0x160   :  { %v1799_v46 = vpack.c.bf16 %v518_v11, %v517_v40  ;;  %v520_v37 = vmax.f32 %v466_v22, 0.0  ;;  %v467_v34 = vadd.f32 %v1670_v13, %v1623_v52  ;;  %v468_v42 = vadd.f32 %v1670_v13, %v1626_v55 }
 0x161   :  { %v1803_v33 = vpack.c.bf16 %v494_v1, %v493_v27  ;;  %v495_v39 = vmax.f32 %v441_v3, 0.0  ;;  %v496_v45 = vmax.f32 %v442_v32, 0.0  ;;  %v505_v52 = vmax.f32 %v1747_v47, 0.0 }
 0x162   :  { %v1813_v44 = vpack.c.bf16 %v520_v37, %v519_v28  ;;  %v506_v2 = vmax.f32 %v1750_v19, 0.0  ;;  %v521_v55 = vmax.f32 %v467_v34, 0.0  ;;  %v522_v0 = vmax.f32 %v468_v42, 0.0 }
 0x163   :  { %1139 = vmatmul.mubr.bf16.gmra.mrb[16].mxu0 %v528_v35  ;;  %1191 = vmatmul.mubr.bf16.gmra.mrb[12].mxu1 %v541_v48  ;;  %v469_v35 = vadd.f32 %v1670_v13, %v1629_v56  ;;  %v470_v48 = vadd.f32 %v1670_v13, %v1632_v59  ;;  %v207_v53 = vadd.s32 120, %v1542_v26  ;;  %v1822_v58 = vpack.c.bf16 %v496_v45, %v495_v39 }
 0x164   :  { %1142 = vmatprep.mubr.msk.bf16.mxu0 %vm1417_vm0, %v1934_v25  ;;  %1194 = vmatprep.mubr.msk.bf16.mxu1 %vm1417_vm0, %v1934_v25  ;;  %v338_v51 = vmul.f32 0.0023148148, %v284_v16  ;;  %v232_v56 = vadd.s32 320, %v1542_v26  ;;  %v233_v62 = vadd.s32 328, %v1542_v26  ;;  %v1828_v59 = vpack.c.bf16 %v522_v0, %v521_v55 }
 0x165   :  { %v523_v61 = vmax.f32 %v469_v35, 0.0  ;;  %v524_v50 = vmax.f32 %v470_v48, 0.0  ;;  %v427_v47 = vadd.f32 %v1670_v13, %v1705_v49  ;;  %v428_v19 = vadd.f32 %v1670_v13, %v1708_v60 }
 0x166   :  { %v339_v63 = vmul.f32 0.0023148148, %v285_v17  ;;  %v529_v14 = vpack.c.bf16 %v480_v41, %v479_v43  ;;  %v542_v16 = vpack.c.bf16 %v506_v2, %v505_v52  ;;  %v453_v26 = vadd.f32 %v1670_v13, %v1726_v12 }
 0x167   :  { %v1836_v30 = vpack.c.bf16 %v524_v50, %v523_v61  ;;  %v454_v49 = vadd.f32 %v1670_v13, %v1729_v21  ;;  %v371_v60 = vmul.f32 %v1546_v31, %v1731_v7  ;;  %v372_v15 = vmul.f32 %v1546_v31, %v1733_v6 }
 0x168   :  { %v260_v9 = vcvt.s32.f32 %v1741_v38  ;;  %v261_v17 = vcvt.s32.f32 %v207_v53  ;;  %v397_v12 = vmul.f32 %v1546_v31, %v338_v51  ;;  %v398_v21 = vmul.f32 %v1546_v31, %v339_v63 }
 0x169   :  { %v286_v29 = vcvt.s32.f32 %v232_v56  ;;  %v287_v43 = vcvt.s32.f32 %v233_v62  ;;  %v481_v41 = vmax.f32 %v427_v47, 0.0  ;;  %v482_v7 = vmax.f32 %v428_v19, 0.0 }
 0x16a   :  { %v507_v24 = vmax.f32 %v453_v26, 0.0  ;;  %v508_v23 = vmax.f32 %v454_v49, 0.0  ;;  %v314_v6 = vmul.f32 0.0023148148, %v260_v9  ;;  %v315_v4 = vmul.f32 0.0023148148, %v261_v17 }
 0x16b   :  { %1143 = vmatmul.mubr.bf16.gmra.mrb[20].mxu0 %v529_v14  ;;  %1195 = vmatmul.mubr.bf16.gmra.mrb[16].mxu1 %v542_v16  ;;  %v429_v38 = vadd.f32 %v1670_v13, %v371_v60  ;;  %v430_v10 = vadd.f32 %v1670_v13, %v372_v15  ;;  %v340_v18 = vmul.f32 0.0023148148, %v286_v29  ;;  %v341_v40 = vmul.f32 0.0023148148, %v287_v43 }
 0x16c   :  { %1146 = vmatprep.mubr.msk.bf16.mxu0 %vm1417_vm0, %v1934_v25  ;;  %1198 = vmatprep.mubr.msk.bf16.mxu1 %vm1417_vm0, %v1934_v25  ;;  %v530_v11 = vpack.c.bf16 %v482_v7, %v481_v41  ;;  %v543_v36 = vpack.c.bf16 %v508_v23, %v507_v24  ;;  %v455_v22 = vadd.f32 %v1670_v13, %v397_v12 }
 0x16d   :  { %v456_v27 = vadd.f32 %v1670_v13, %v398_v21  ;;  %v373_v1 = vmul.f32 %v1546_v31, %v314_v6  ;;  %v374_v3 = vmul.f32 %v1546_v31, %v315_v4  ;;  %v399_v28 = vmul.f32 %v1546_v31, %v340_v18 }
 0x16e   :  { %v400_v37 = vmul.f32 %v1546_v31, %v341_v40  ;;  %v483_v32 = vmax.f32 %v429_v38, 0.0  ;;  %v484_v39 = vmax.f32 %v430_v10, 0.0  ;;  %v509_v34 = vmax.f32 %v455_v22, 0.0 }
 0x16f   :  { %v510_v42 = vmax.f32 %v456_v27, 0.0  ;;  %v431_v45 = vadd.f32 %v1670_v13, %v373_v1  ;;  %v432_v35 = vadd.f32 %v1670_v13, %v374_v3  ;;  %v457_v2 = vadd.f32 %v1670_v13, %v399_v28 }
 0x170   :  { %v531_v48 = vpack.c.bf16 %v484_v39, %v483_v32  ;;  %v458_v55 = vadd.f32 %v1670_v13, %v400_v37 }
 0x171   :  { %v544_v52 = vpack.c.bf16 %v510_v42, %v509_v34  ;;  %v485_v31 = vmax.f32 %v431_v45, 0.0  ;;  %v486_v0 = vmax.f32 %v432_v35, 0.0  ;;  %v511_v53 = vmax.f32 %v457_v2, 0.0 }
 0x172   :  { %v512_v61 = vmax.f32 %v458_v55, 0.0 }
 0x173   :  { %1147 = vmatmul.mubr.bf16.gmra.mrb[24].mxu0 %v530_v11  ;;  %1199 = vmatmul.mubr.bf16.gmra.mrb[20].mxu1 %v543_v36  ;;  %v532_v50 = vpack.c.bf16 %v486_v0, %v485_v31 }
 0x174   :  { %1150 = vmatprep.mubr.msk.bf16.mxu0 %vm1417_vm0, %v1934_v25  ;;  %1202 = vmatprep.mubr.msk.bf16.mxu1 %vm1417_vm0, %v1934_v25  ;;  %v545_v51 = vpack.c.bf16 %v512_v61, %v511_v53 }
 0x17b   :  { %1151 = vmatmul.mubr.bf16.gmra.mrb[28].mxu0 %v531_v48  ;;  %1203 = vmatmul.mubr.bf16.gmra.mrb[24].mxu1 %v544_v52 }
 0x17c   :  { %1154 = vmatprep.mubr.msk.bf16.mxu0 %vm1417_vm0, %v1934_v25  ;;  %1206 = vmatprep.mubr.msk.bf16.mxu1 %vm1417_vm0, %v1934_v25 }
 0x183   :  { %1155 = vmatmul.mubr.bf16.gmra.mrb[32].mxu0 %v532_v50  ;;  %1207 = vmatmul.mubr.bf16.gmra.mrb[28].mxu1 %v545_v51 }
 0x184   :  { %1158 = vmatprep.mubr.msk.bf16.mxu0 %vm1417_vm0, %v1934_v25  ;;  %1210 = vmatprep.mubr.msk.bf16.mxu1 %vm1417_vm0, %v1934_v25 }
 0x18b   :  { %1159 = vmatmul.mubr.bf16.gmra.mrb[36].mxu0 %v1771_v57  ;;  %1211 = vmatmul.mubr.bf16.gmra.mrb[32].mxu1 %v1775_v8 }
 0x18c   :  { %1162 = vmatprep.mubr.msk.bf16.mxu0 %vm1417_vm0, %v1934_v25  ;;  %1214 = vmatprep.mubr.msk.bf16.mxu1 %vm1417_vm0, %v1934_v25 }
 0x193   :  { %1163 = vmatmul.mubr.bf16.gmra.mrb[40].mxu0 %v1779_v5  ;;  %1215 = vmatmul.mubr.bf16.gmra.mrb[36].mxu1 %v1785_v20 }
 0x194   :  { %1166 = vmatprep.mubr.msk.bf16.mxu0 %vm1417_vm0, %v1934_v25  ;;  %1218 = vmatprep.mubr.msk.bf16.mxu1 %vm1417_vm0, %v1934_v25 }
 0x19b   :  { %1167 = vmatmul.mubr.bf16.gmra.mrb[44].mxu0 %v1795_v54  ;;  %1219 = vmatmul.mubr.bf16.gmra.mrb[40].mxu1 %v1799_v46 }
 0x19c   :  { %1170 = vmatprep.mubr.msk.bf16.mxu0 %vm1417_vm0, %v1934_v25  ;;  %1222 = vmatprep.mubr.msk.bf16.mxu1 %vm1417_vm0, %v1934_v25 }
 0x1a3   :  { %1171 = vmatmul.mubr.bf16.gmra.mrb[48].mxu0 %v1803_v33  ;;  %1223 = vmatmul.mubr.bf16.gmra.mrb[44].mxu1 %v1813_v44 }
 0x1a4   :  { %1174 = vmatprep.mubr.msk.bf16.mxu0 %vm1417_vm0, %v1934_v25  ;;  %1226 = vmatprep.mubr.msk.bf16.mxu1 %vm1417_vm0, %v1934_v25 }
 0x1ab   :  { %1175 = vmatmul.mubr.bf16.gmra.mrb[52].mxu0 %v1822_v58  ;;  %1227 = vmatmul.mubr.bf16.gmra.mrb[48].mxu1 %v1828_v59 }
 0x1ac   :  { %1230 = vmatprep.mubr.msk.bf16.mxu1 %vm1417_vm0, %v1934_v25 }
 0x1b3   :  { %1231 = vmatmul.mubr.bf16.gmra.mrb[52].mxu1 %v1836_v30 }
 0x21e   :  { %v650_v13 = vpop.f32.mrb[4].mxu0  ;;  %v754_v57 = vpop.f32.mrb[0].mxu1 }
 0x21f   :  { %v865_v8 = vand.u32 2147483647, %v650_v13  ;;  %v891_v5 = vand.u32 2147483647, %v754_v57  ;;  %v1128_v20 = vpop.f32.mrb[5].mxu0  ;;  %v1180_v54 = vpop.f32.mrb[1].mxu1 }
 0x220   :  { %v653_v46 = vpop.f32.mrb[6].mxu0  ;;  %v757_v33 = vpop.f32.mrb[2].mxu1 }
 0x221   :  { %v919_v44 = vmul.f32 1e-12, %v865_v8  ;;  %v945_v56 = vmul.f32 1e-12, %v891_v5  ;;  %v866_v62 = vand.u32 2147483647, %v653_v46 }
 0x222   :  { %v892_v47 = vand.u32 2147483647, %v757_v33  ;;  %v1129_v58 = vpop.f32.mrb[7].mxu0  ;;  %v1181_v19 = vpop.f32.mrb[3].mxu1 }
 0x223   :  { %973 = vst [vmem:[#allocation12] sm:$0xff] %v919_v44  ;;  %999 = vst [vmem:[#allocation12 + $0xd0] sm:$0xff] %v945_v56  ;;  %v920_v59 = vmul.f32 1e-12, %v866_v62 }
 0x224   :  { %v946_v25 = vmul.f32 1e-12, %v892_v47 }
 0x225   :  { %974 = vst [vmem:[#allocation12 + $0x8] sm:$0xff] %v920_v59 }
 0x226   :  { %1000 = vst [vmem:[#allocation12 + $0xd8] sm:$0xff] %v946_v25  ;;  %v658_v63 = vpop.f32.mrb[8].mxu0  ;;  %v762_v30 = vpop.f32.mrb[4].mxu1 }
 0x227   :  { %v867_v14 = vand.u32 2147483647, %v658_v63  ;;  %v893_v16 = vand.u32 2147483647, %v762_v30  ;;  %v1132_v26 = vpop.f32.mrb[9].mxu0  ;;  %v1184_v49 = vpop.f32.mrb[5].mxu1 }
 0x228   :  { %v661_v60 = vpop.f32.mrb[10].mxu0  ;;  %v765_v15 = vpop.f32.mrb[6].mxu1 }
 0x229   :  { %v921_v9 = vmul.f32 1e-12, %v867_v14  ;;  %v947_v17 = vmul.f32 1e-12, %v893_v16  ;;  %v868_v12 = vand.u32 2147483647, %v661_v60 }
 0x22a   :  { %v894_v21 = vand.u32 2147483647, %v765_v15  ;;  %v1133_v29 = vpop.f32.mrb[11].mxu0  ;;  %v1185_v43 = vpop.f32.mrb[7].mxu1 }
 0x22b   :  { %975 = vst [vmem:[#allocation12 + $0x10] sm:$0xff] %v921_v9  ;;  %1001 = vst [vmem:[#allocation12 + $0xe0] sm:$0xff] %v947_v17  ;;  %v922_v41 = vmul.f32 1e-12, %v868_v12 }
 0x22c   :  { %v948_v7 = vmul.f32 1e-12, %v894_v21 }
 0x22d   :  { %976 = vst [vmem:[#allocation12 + $0x18] sm:$0xff] %v922_v41 }
 0x22e   :  { %1002 = vst [vmem:[#allocation12 + $0xe8] sm:$0xff] %v948_v7  ;;  %v666_v24 = vpop.f32.mrb[12].mxu0  ;;  %v770_v23 = vpop.f32.mrb[8].mxu1 }
 0x22f   :  { %v869_v6 = vand.u32 2147483647, %v666_v24  ;;  %v895_v4 = vand.u32 2147483647, %v770_v23  ;;  %v1136_v38 = vpop.f32.mrb[13].mxu0  ;;  %v1188_v10 = vpop.f32.mrb[9].mxu1 }
 0x230   :  { %v669_v18 = vpop.f32.mrb[14].mxu0  ;;  %v773_v40 = vpop.f32.mrb[10].mxu1 }
 0x231   :  { %v923_v11 = vmul.f32 1e-12, %v869_v6  ;;  %v949_v36 = vmul.f32 1e-12, %v895_v4  ;;  %v870_v22 = vand.u32 2147483647, %v669_v18 }
 0x232   :  { %v896_v27 = vand.u32 2147483647, %v773_v40  ;;  %v1137_v1 = vpop.f32.mrb[15].mxu0  ;;  %v1189_v3 = vpop.f32.mrb[11].mxu1 }
 0x233   :  { %977 = vst [vmem:[#allocation12 + $0x20] sm:$0xff] %v923_v11  ;;  %1003 = vst [vmem:[#allocation12 + $0xf0] sm:$0xff] %v949_v36  ;;  %v924_v28 = vmul.f32 1e-12, %v870_v22 }
 0x234   :  { %v950_v37 = vmul.f32 1e-12, %v896_v27 }
 0x235   :  { %978 = vst [vmem:[#allocation12 + $0x28] sm:$0xff] %v924_v28 }
 0x236   :  { %1004 = vst [vmem:[#allocation12 + $0xf8] sm:$0xff] %v950_v37  ;;  %v674_v32 = vpop.f32.mrb[16].mxu0  ;;  %v778_v39 = vpop.f32.mrb[12].mxu1 }
 0x237   :  { %v871_v34 = vand.u32 2147483647, %v674_v32  ;;  %v897_v42 = vand.u32 2147483647, %v778_v39  ;;  %v1140_v45 = vpop.f32.mrb[17].mxu0  ;;  %v1192_v35 = vpop.f32.mrb[13].mxu1 }
 0x238   :  { %v677_v48 = vpop.f32.mrb[18].mxu0  ;;  %v781_v52 = vpop.f32.mrb[14].mxu1 }
 0x239   :  { %v925_v2 = vmul.f32 1e-12, %v871_v34  ;;  %v951_v55 = vmul.f32 1e-12, %v897_v42  ;;  %v872_v31 = vand.u32 2147483647, %v677_v48 }
 0x23a   :  { %v898_v0 = vand.u32 2147483647, %v781_v52  ;;  %v1141_v53 = vpop.f32.mrb[19].mxu0  ;;  %v1193_v61 = vpop.f32.mrb[15].mxu1 }
 0x23b   :  { %979 = vst [vmem:[#allocation12 + $0x30] sm:$0xff] %v925_v2  ;;  %1005 = vst [vmem:[#allocation12 + $0x100] sm:$0xff] %v951_v55  ;;  %v926_v50 = vmul.f32 1e-12, %v872_v31 }
 0x23c   :  { %v952_v51 = vmul.f32 1e-12, %v898_v0 }
 0x23d   :  { %980 = vst [vmem:[#allocation12 + $0x38] sm:$0xff] %v926_v50 }
 0x23e   :  { %1006 = vst [vmem:[#allocation12 + $0x108] sm:$0xff] %v952_v51  ;;  %v682_v13 = vpop.f32.mrb[20].mxu0  ;;  %v786_v57 = vpop.f32.mrb[16].mxu1 }
 0x23f   :  { %v873_v8 = vand.u32 2147483647, %v682_v13  ;;  %v899_v5 = vand.u32 2147483647, %v786_v57  ;;  %v1144_v20 = vpop.f32.mrb[21].mxu0  ;;  %v1196_v54 = vpop.f32.mrb[17].mxu1 }
 0x240   :  { %v685_v46 = vpop.f32.mrb[22].mxu0  ;;  %v789_v33 = vpop.f32.mrb[18].mxu1 }
 0x241   :  { %v927_v44 = vmul.f32 1e-12, %v873_v8  ;;  %v953_v56 = vmul.f32 1e-12, %v899_v5  ;;  %v874_v62 = vand.u32 2147483647, %v685_v46 }
 0x242   :  { %v900_v47 = vand.u32 2147483647, %v789_v33  ;;  %v1145_v58 = vpop.f32.mrb[23].mxu0  ;;  %v1197_v19 = vpop.f32.mrb[19].mxu1 }
 0x243   :  { %981 = vst [vmem:[#allocation12 + $0x40] sm:$0xff] %v927_v44  ;;  %1007 = vst [vmem:[#allocation12 + $0x110] sm:$0xff] %v953_v56  ;;  %v928_v59 = vmul.f32 1e-12, %v874_v62 }
 0x244   :  { %v954_v25 = vmul.f32 1e-12, %v900_v47 }
 0x245   :  { %982 = vst [vmem:[#allocation12 + $0x48] sm:$0xff] %v928_v59 }
 0x246   :  { %1008 = vst [vmem:[#allocation12 + $0x118] sm:$0xff] %v954_v25  ;;  %v690_v63 = vpop.f32.mrb[24].mxu0  ;;  %v794_v30 = vpop.f32.mrb[20].mxu1 }
 0x247   :  { %v875_v14 = vand.u32 2147483647, %v690_v63  ;;  %v901_v16 = vand.u32 2147483647, %v794_v30  ;;  %v1148_v26 = vpop.f32.mrb[25].mxu0  ;;  %v1200_v49 = vpop.f32.mrb[21].mxu1 }
 0x248   :  { %v693_v60 = vpop.f32.mrb[26].mxu0  ;;  %v797_v15 = vpop.f32.mrb[22].mxu1 }
 0x249   :  { %v929_v9 = vmul.f32 1e-12, %v875_v14  ;;  %v955_v17 = vmul.f32 1e-12, %v901_v16  ;;  %v876_v12 = vand.u32 2147483647, %v693_v60 }
 0x24a   :  { %v902_v21 = vand.u32 2147483647, %v797_v15  ;;  %v1149_v29 = vpop.f32.mrb[27].mxu0  ;;  %v1201_v43 = vpop.f32.mrb[23].mxu1 }
 0x24b   :  { %983 = vst [vmem:[#allocation12 + $0x50] sm:$0xff] %v929_v9  ;;  %1009 = vst [vmem:[#allocation12 + $0x120] sm:$0xff] %v955_v17  ;;  %v930_v41 = vmul.f32 1e-12, %v876_v12 }
 0x24c   :  { %v956_v7 = vmul.f32 1e-12, %v902_v21 }
 0x24d   :  { %984 = vst [vmem:[#allocation12 + $0x58] sm:$0xff] %v930_v41 }
 0x24e   :  { %1010 = vst [vmem:[#allocation12 + $0x128] sm:$0xff] %v956_v7  ;;  %v698_v24 = vpop.f32.mrb[28].mxu0  ;;  %v802_v23 = vpop.f32.mrb[24].mxu1 }
 0x24f   :  { %v877_v6 = vand.u32 2147483647, %v698_v24  ;;  %v903_v4 = vand.u32 2147483647, %v802_v23  ;;  %v1152_v38 = vpop.f32.mrb[29].mxu0  ;;  %v1204_v10 = vpop.f32.mrb[25].mxu1 }
 0x250   :  { %v701_v18 = vpop.f32.mrb[30].mxu0  ;;  %v805_v40 = vpop.f32.mrb[26].mxu1 }
 0x251   :  { %v931_v11 = vmul.f32 1e-12, %v877_v6  ;;  %v957_v36 = vmul.f32 1e-12, %v903_v4  ;;  %v878_v22 = vand.u32 2147483647, %v701_v18 }
 0x252   :  { %v904_v27 = vand.u32 2147483647, %v805_v40  ;;  %v1153_v1 = vpop.f32.mrb[31].mxu0  ;;  %v1205_v3 = vpop.f32.mrb[27].mxu1 }
 0x253   :  { %985 = vst [vmem:[#allocation12 + $0x60] sm:$0xff] %v931_v11  ;;  %1011 = vst [vmem:[#allocation12 + $0x130] sm:$0xff] %v957_v36  ;;  %v932_v28 = vmul.f32 1e-12, %v878_v22 }
 0x254   :  { %v958_v37 = vmul.f32 1e-12, %v904_v27 }
 0x255   :  { %986 = vst [vmem:[#allocation12 + $0x68] sm:$0xff] %v932_v28 }
 0x256   :  { %1012 = vst [vmem:[#allocation12 + $0x138] sm:$0xff] %v958_v37  ;;  %v706_v32 = vpop.f32.mrb[32].mxu0  ;;  %v810_v39 = vpop.f32.mrb[28].mxu1 }
 0x257   :  { %v879_v34 = vand.u32 2147483647, %v706_v32  ;;  %v905_v42 = vand.u32 2147483647, %v810_v39  ;;  %v1156_v45 = vpop.f32.mrb[33].mxu0  ;;  %v1208_v35 = vpop.f32.mrb[29].mxu1 }
 0x258   :  { %v709_v48 = vpop.f32.mrb[34].mxu0  ;;  %v813_v52 = vpop.f32.mrb[30].mxu1 }
 0x259   :  { %v933_v2 = vmul.f32 1e-12, %v879_v34  ;;  %v959_v55 = vmul.f32 1e-12, %v905_v42  ;;  %v880_v31 = vand.u32 2147483647, %v709_v48 }
 0x25a   :  { %v906_v0 = vand.u32 2147483647, %v813_v52  ;;  %v1157_v53 = vpop.f32.mrb[35].mxu0  ;;  %v1209_v61 = vpop.f32.mrb[31].mxu1 }
 0x25b   :  { %987 = vst [vmem:[#allocation12 + $0x70] sm:$0xff] %v933_v2  ;;  %1013 = vst [vmem:[#allocation12 + $0x140] sm:$0xff] %v959_v55  ;;  %v934_v50 = vmul.f32 1e-12, %v880_v31 }
 0x25c   :  { %v960_v51 = vmul.f32 1e-12, %v906_v0 }
 0x25d   :  { %988 = vst [vmem:[#allocation12 + $0x78] sm:$0xff] %v934_v50 }
 0x25e   :  { %1014 = vst [vmem:[#allocation12 + $0x148] sm:$0xff] %v960_v51  ;;  %v714_v13 = vpop.f32.mrb[36].mxu0  ;;  %v818_v57 = vpop.f32.mrb[32].mxu1 }
 0x25f   :  { %v881_v8 = vand.u32 2147483647, %v714_v13  ;;  %v907_v5 = vand.u32 2147483647, %v818_v57  ;;  %v1160_v20 = vpop.f32.mrb[37].mxu0  ;;  %v1212_v54 = vpop.f32.mrb[33].mxu1 }
 0x260   :  { %v717_v46 = vpop.f32.mrb[38].mxu0  ;;  %v821_v33 = vpop.f32.mrb[34].mxu1 }
 0x261   :  { %v935_v44 = vmul.f32 1e-12, %v881_v8  ;;  %v961_v56 = vmul.f32 1e-12, %v907_v5  ;;  %v882_v62 = vand.u32 2147483647, %v717_v46 }
 0x262   :  { %v908_v47 = vand.u32 2147483647, %v821_v33  ;;  %v1161_v58 = vpop.f32.mrb[39].mxu0  ;;  %v1213_v19 = vpop.f32.mrb[35].mxu1 }
 0x263   :  { %989 = vst [vmem:[#allocation12 + $0x80] sm:$0xff] %v935_v44  ;;  %1015 = vst [vmem:[#allocation12 + $0x150] sm:$0xff] %v961_v56  ;;  %v936_v59 = vmul.f32 1e-12, %v882_v62 }
 0x264   :  { %v962_v25 = vmul.f32 1e-12, %v908_v47 }
 0x265   :  { %990 = vst [vmem:[#allocation12 + $0x88] sm:$0xff] %v936_v59 }
 0x266   :  { %1016 = vst [vmem:[#allocation12 + $0x158] sm:$0xff] %v962_v25  ;;  %v722_v63 = vpop.f32.mrb[40].mxu0  ;;  %v826_v30 = vpop.f32.mrb[36].mxu1 }
 0x267   :  { %v883_v14 = vand.u32 2147483647, %v722_v63  ;;  %v909_v16 = vand.u32 2147483647, %v826_v30  ;;  %v1164_v26 = vpop.f32.mrb[41].mxu0  ;;  %v1216_v49 = vpop.f32.mrb[37].mxu1 }
 0x268   :  { %v725_v60 = vpop.f32.mrb[42].mxu0  ;;  %v829_v15 = vpop.f32.mrb[38].mxu1 }
 0x269   :  { %v937_v9 = vmul.f32 1e-12, %v883_v14  ;;  %v963_v17 = vmul.f32 1e-12, %v909_v16  ;;  %v884_v12 = vand.u32 2147483647, %v725_v60 }
 0x26a   :  { %v910_v21 = vand.u32 2147483647, %v829_v15  ;;  %v1165_v29 = vpop.f32.mrb[43].mxu0  ;;  %v1217_v43 = vpop.f32.mrb[39].mxu1 }
 0x26b   :  { %991 = vst [vmem:[#allocation12 + $0x90] sm:$0xff] %v937_v9  ;;  %1017 = vst [vmem:[#allocation12 + $0x160] sm:$0xff] %v963_v17  ;;  %v938_v41 = vmul.f32 1e-12, %v884_v12 }
 0x26c   :  { %v964_v7 = vmul.f32 1e-12, %v910_v21 }
 0x26d   :  { %992 = vst [vmem:[#allocation12 + $0x98] sm:$0xff] %v938_v41 }
 0x26e   :  { %1018 = vst [vmem:[#allocation12 + $0x168] sm:$0xff] %v964_v7  ;;  %v730_v24 = vpop.f32.mrb[44].mxu0  ;;  %v834_v23 = vpop.f32.mrb[40].mxu1 }
 0x26f   :  { %v885_v6 = vand.u32 2147483647, %v730_v24  ;;  %v911_v4 = vand.u32 2147483647, %v834_v23  ;;  %v1168_v38 = vpop.f32.mrb[45].mxu0  ;;  %v1220_v10 = vpop.f32.mrb[41].mxu1 }
 0x270   :  { %v733_v18 = vpop.f32.mrb[46].mxu0  ;;  %v837_v40 = vpop.f32.mrb[42].mxu1 }
 0x271   :  { %v939_v11 = vmul.f32 1e-12, %v885_v6  ;;  %v965_v36 = vmul.f32 1e-12, %v911_v4  ;;  %v886_v22 = vand.u32 2147483647, %v733_v18 }
 0x272   :  { %v912_v27 = vand.u32 2147483647, %v837_v40  ;;  %v1169_v1 = vpop.f32.mrb[47].mxu0  ;;  %v1221_v3 = vpop.f32.mrb[43].mxu1 }
 0x273   :  { %993 = vst [vmem:[#allocation12 + $0xa0] sm:$0xff] %v939_v11  ;;  %1019 = vst [vmem:[#allocation12 + $0x170] sm:$0xff] %v965_v36  ;;  %v940_v28 = vmul.f32 1e-12, %v886_v22 }
 0x274   :  { %v966_v37 = vmul.f32 1e-12, %v912_v27 }
 0x275   :  { %994 = vst [vmem:[#allocation12 + $0xa8] sm:$0xff] %v940_v28 }
 0x276   :  { %1020 = vst [vmem:[#allocation12 + $0x178] sm:$0xff] %v966_v37  ;;  %v738_v32 = vpop.f32.mrb[48].mxu0  ;;  %v842_v39 = vpop.f32.mrb[44].mxu1 }
 0x277   :  { %v887_v34 = vand.u32 2147483647, %v738_v32  ;;  %v913_v42 = vand.u32 2147483647, %v842_v39  ;;  %v1172_v45 = vpop.f32.mrb[49].mxu0  ;;  %v1224_v35 = vpop.f32.mrb[45].mxu1 }
 0x278   :  { %v741_v48 = vpop.f32.mrb[50].mxu0  ;;  %v845_v52 = vpop.f32.mrb[46].mxu1 }
 0x279   :  { %v941_v2 = vmul.f32 1e-12, %v887_v34  ;;  %v967_v55 = vmul.f32 1e-12, %v913_v42  ;;  %v888_v31 = vand.u32 2147483647, %v741_v48 }
 0x27a   :  { %v914_v0 = vand.u32 2147483647, %v845_v52  ;;  %v1173_v53 = vpop.f32.mrb[51].mxu0  ;;  %v1225_v61 = vpop.f32.mrb[47].mxu1 }
 0x27b   :  { %995 = vst [vmem:[#allocation12 + $0xb0] sm:$0xff] %v941_v2  ;;  %1021 = vst [vmem:[#allocation12 + $0x180] sm:$0xff] %v967_v55  ;;  %v942_v50 = vmul.f32 1e-12, %v888_v31 }
 0x27c   :  { %v968_v51 = vmul.f32 1e-12, %v914_v0 }
 0x27d   :  { %996 = vst [vmem:[#allocation12 + $0xb8] sm:$0xff] %v942_v50 }
 0x27e   :  { %1022 = vst [vmem:[#allocation12 + $0x188] sm:$0xff] %v968_v51  ;;  %v746_v13 = vpop.f32.mrb[52].mxu0  ;;  %v850_v57 = vpop.f32.mrb[48].mxu1 }
 0x27f   :  { %v889_v8 = vand.u32 2147483647, %v746_v13  ;;  %v915_v5 = vand.u32 2147483647, %v850_v57  ;;  %v1176_v20 = vpop.f32.mrb[53].mxu0  ;;  %v1228_v54 = vpop.f32.mrb[49].mxu1 }
 0x280   :  { %v749_v46 = vpop.f32.mrb[54].mxu0  ;;  %v853_v33 = vpop.f32.mrb[50].mxu1 }
 0x281   :  { %v943_v44 = vmul.f32 1e-12, %v889_v8  ;;  %v969_v56 = vmul.f32 1e-12, %v915_v5  ;;  %v890_v62 = vand.u32 2147483647, %v749_v46 }
 0x282   :  { %v916_v47 = vand.u32 2147483647, %v853_v33  ;;  %v1177_v58 = vpop.f32.mrb[55].mxu0  ;;  %v1229_v19 = vpop.f32.mrb[51].mxu1 }
 0x283   :  { %997 = vst [vmem:[#allocation12 + $0xc0] sm:$0xff] %v943_v44  ;;  %1023 = vst [vmem:[#allocation12 + $0x190] sm:$0xff] %v969_v56  ;;  %v944_v59 = vmul.f32 1e-12, %v890_v62 }
 0x284   :  { %v970_v25 = vmul.f32 1e-12, %v916_v47 }
 0x285   :  { %998 = vst [vmem:[#allocation12 + $0xc8] sm:$0xff] %v944_v59 }
 0x286   :  { %1024 = vst [vmem:[#allocation12 + $0x198] sm:$0xff] %v970_v25  ;;  %v858_v63 = vpop.f32.mrb[52].mxu1 }
 0x287   :  { %v917_v30 = vand.u32 2147483647, %v858_v63  ;;  %v1232_v14 = vpop.f32.mrb[53].mxu1 }
 0x288   :  { %v861_v16 = vpop.f32.mrb[54].mxu1 }
 0x289   :  { %v971_v26 = vmul.f32 1e-12, %v917_v30  ;;  %v918_v49 = vand.u32 2147483647, %v861_v16  ;;  %v1233_v60 = vpop.f32.mrb[55].mxu1 }
 0x28b   :  { %1025 = vst [vmem:[#allocation12 + $0x1a0] sm:$0xff] %v971_v26  ;;  %v972_v15 = vmul.f32 1e-12, %v918_v49 }
 0x28d   :  { %1026 = vst [vmem:[#allocation12 + $0x1a8] sm:$0xff] %v972_v15 }
 0x28e   :  { %1386 = shalt.err (!%p1383_p11)
}
 0x28f   :  { %s1387_s14 = scalar_lea.hbm %s1931_s6, 6912 }
 0x290   :  { %p1388_p12 = scmp.ne.s32.totalorder %s1931_s6, %s1387_s14  ;;  %p1391_p13 = scmp.lt.u32.totalorder %s1387_s14, %s1931_s6 }
 0x292   :  { %p1393_p0 = pnand %p1391_p13, %p1388_p12 }
 0x294   :  { %1396 = shalt.err (!%p1393_p0)
}
 0x295   :  { %1038 = dma.vmem_to_hbm [thread:$0]  %s1033_s10, 6912, %s1931_s6, [#allocation4], %s1411_s1, %s1411_s1, %s1412_s24  }
 0x296   :  { %1405 = dma.done.wait [#allocation4], 6912  }
 0x297   :  { %1406 = vsyncadd [#allocation4], 4294960384 }
 0x298   :  { %1042 = vsyncpa [#allocation3], 1 }
 0x299   :  { %1043 = vsyncpa [#allocation8], 1 }
 0x29a   :  { %1044 = vsyncpa [#allocation11], 1 }
 0x29b   :  { %1045 = vsyncpa [#allocation4], 1 }
 0x29c   :  { %1046 = vsyncpa [#allocation5], 1 }

</bundles_post_ra>
